<compile_context>
chip_gen: v7x
topology: tpu7x:2x2x1
jax: 0.10.0
libtpu: 0.0.40
codegen_flags: <defaults>
</compile_context>

<pallas_src>
import math

import jax
import jax.numpy as jnp
from jax import lax
from jax.experimental import pallas as pl
from jax.experimental.pallas import tpu as pltpu

EPS = 1e-5
H = 3  # forward() hardcodes x.view(-1, 1, 3, 1)  =>  spatial height = n_input = 3


# ------------------------------ kernel helpers -------------------------------

def _bn_relu(y, gamma, beta, count):
    """Training-mode BatchNorm2d (batch stats, biased var, eps=1e-5) + ReLU.

    Single pass: sum and sum-of-squares in one traversal, var = E[y^2]-mean^2
    (f32 accumulation, clamped at 0 against cancellation).
    y: (rows, C) f32; gamma / beta: (1, C).
    """
    inv_n = 1.0 / count
    s = jnp.sum(y, axis=0, keepdims=True)
    ss = jnp.sum(y * y, axis=0, keepdims=True)
    mean = s * inv_n
    var = jnp.maximum(ss * inv_n - mean * mean, 0.0)
    scale = gamma * lax.rsqrt(var + EPS)     # (1, C)
    shift = beta - mean * scale              # (1, C)
    return jnp.maximum(y * scale + shift, 0.0)


# ------------------------------- fused kernel --------------------------------

def _make_kernel(N, dims):
    e1, e2, e3, n_z, d1, d2, d3, n_in = dims
    # lane offsets into the packed (2, sumC) gamma/beta operand
    o_e1 = 0
    o_e2 = o_e1 + e1
    o_e3 = o_e2 + e2
    o_d1 = o_e3 + e3
    o_d2 = o_d1 + d1
    o_d3 = o_d2 + d2

    def kernel(
        # inputs
        x_ref,                          # (3N, 1)   h-major rows
        w1_ref,                         # (1, e1)
        w2_ref,                         # (e1, e2)
        w3_ref,                         # (e2, e3)
        wz_ref,                         # (3, e3, n_z)   per-h permuted z weight
        wd1_ref,                        # (n_z, d1)
        wd2_ref,                        # (d1, d2)
        wd3_ref,                        # (d2, d3)
        wxb_ref,                        # (d3, n_in)
        gb_ref,                         # (2, e1+e2+e3+d1+d2+d3)  [gamma; beta]
        bias_ref,                       # (1, n_z + n_in)         [z_b | xbar_b]
        # outputs
        h1_ref,                         # (3N, e1)  h-major
        h2_ref,                         # (3N, e2)
        h3_ref,                         # (3N, e3)
        z_ref,                          # (N, n_z)
        xbar_ref,                       # (N, n_in)
    ):
        rows_enc = float(H * N)
        rows_dec = float(N)

        gb = gb_ref[...]                                 # (2, sumC)

        def gamma_beta(off, c):
            return gb[0:1, off:off + c], gb[1:2, off:off + c]

        # --- encoder (h-major stacked (3N, C) tiles) ---
        # conv1 (Cin == 1): broadcast-multiply on the VPU, no K=1 MXU pass.
        # Conv biases are dropped: cancelled by the BN mean subtraction.
        x = x_ref[...]                                   # (3N, 1)
        g, b = gamma_beta(o_e1, e1)
        h1 = _bn_relu(x * w1_ref[...], g, b, rows_enc)   # (3N, e1)

        g, b = gamma_beta(o_e2, e2)
        h2 = _bn_relu(
            jnp.dot(h1, w2_ref[...], preferred_element_type=jnp.float32),
            g, b, rows_enc)                              # (3N, e2)

        g, b = gamma_beta(o_e3, e3)
        h3 = _bn_relu(
            jnp.dot(h2, w3_ref[...], preferred_element_type=jnp.float32),
            g, b, rows_enc)                              # (3N, e3)

        # single contiguous store per intermediate
        h1_ref[...] = h1
        h2_ref[...] = h2
        h3_ref[...] = h3

        # --- latent:  z = enc_h3.view(N, -1) @ Wz + bz ---
        # Wz is pre-permuted per spatial position h, so the h-major stacked
        # activation needs no in-kernel NCHW flatten / transpose.
        bias = bias_ref[...]                             # (1, n_z + n_in)
        z = bias[:, 0:n_z]                               # (1, n_z) broadcast init
        for h in range(H):
            z = z + jnp.dot(h3[h * N:(h + 1) * N, :], wz_ref[h],
                            preferred_element_type=jnp.float32)
        z_ref[...] = z

        # --- decoder (spatial dims 1x1 -> rows = N; conv biases dropped) ---
        g, b = gamma_beta(o_d1, d1)
        y = _bn_relu(jnp.dot(z, wd1_ref[...], preferred_element_type=jnp.float32),
                     g, b, rows_dec)
        g, b = gamma_beta(o_d2, d2)
        y = _bn_relu(jnp.dot(y, wd2_ref[...], preferred_element_type=jnp.float32),
                     g, b, rows_dec)
        g, b = gamma_beta(o_d3, d3)
        y = _bn_relu(jnp.dot(y, wd3_ref[...], preferred_element_type=jnp.float32),
                     g, b, rows_dec)

        xbar_ref[...] = (
            jnp.dot(y, wxb_ref[...], preferred_element_type=jnp.float32)
            + bias[:, n_z:n_z + n_in]
        )

    return kernel


# --------------------------------- wrapper -----------------------------------

def ae_forward(x, p):
    """x: (N, 3) float32.  Mirrors AE.forward (training-mode BatchNorm)."""
    N = x.shape[0]
    e1 = p["enc1_w"].shape[1]
    e2 = p["enc2_w"].shape[1]
    e3 = p["enc3_w"].shape[1]
    n_z = p["z_w"].shape[1]
    d1 = p["dec1_w"].shape[1]
    d2 = p["dec2_w"].shape[1]
    d3 = p["dec3_w"].shape[1]
    n_in = p["xbar_w"].shape[1]

    # h-major row layout: row h*N + n holds x[n, h]
    x_hm = jnp.transpose(x).reshape(H * N, 1)

    # z_w rows index the NCHW flat feature c*3 + h; regroup per spatial pos h.
    wz_perm = p["z_w"].reshape(e3, H, n_z).transpose(1, 0, 2)     # (3, e3, n_z)

    # pack the six gamma/beta pairs and the two linear biases
    gammas = jnp.concatenate([p["bn_e1_g"], p["bn_e2_g"], p["bn_e3_g"],
                              p["bn_d1_g"], p["bn_d2_g"], p["bn_d3_g"]])
    betas = jnp.concatenate([p["bn_e1_b"], p["bn_e2_b"], p["bn_e3_b"],
                             p["bn_d1_b"], p["bn_d2_b"], p["bn_d3_b"]])
    gb_packed = jnp.stack([gammas, betas], axis=0)                # (2, sumC)
    bias_packed = jnp.concatenate(
        [p["z_b"], p["xbar_b"]]).reshape(1, n_z + n_in)           # (1, n_z+n_in)

    operands = (
        x_hm,
        p["enc1_w"], p["enc2_w"], p["enc3_w"], wz_perm,
        p["dec1_w"], p["dec2_w"], p["dec3_w"], p["xbar_w"],
        gb_packed, bias_packed,
    )

    out_shape = (
        jax.ShapeDtypeStruct((H * N, e1), jnp.float32),   # enc_h1 (h-major)
        jax.ShapeDtypeStruct((H * N, e2), jnp.float32),   # enc_h2 (h-major)
        jax.ShapeDtypeStruct((H * N, e3), jnp.float32),   # enc_h3 (h-major)
        jax.ShapeDtypeStruct((N, n_z), jnp.float32),      # z
        jax.ShapeDtypeStruct((N, n_in), jnp.float32),     # x_bar
    )

    flops = 2 * (H * N * (e1 + e1 * e2 + e2 * e3)
                 + N * (H * e3 * n_z + n_z * d1 + d1 * d2 + d2 * d3 + d3 * n_in))
    n_bytes = 4 * (sum(math.prod(a.shape) for a in operands)
                   + sum(math.prod(s.shape) for s in out_shape))
    cost = pl.CostEstimate(flops=flops,
                           transcendentals=e1 + e2 + e3 + d1 + d2 + d3,
                           bytes_accessed=n_bytes)

    kernel = _make_kernel(N, (e1, e2, e3, n_z, d1, d2, d3, n_in))
    h1_hm, h2_hm, h3_hm, z, x_bar = pl.pallas_call(
        kernel,
        out_shape=out_shape,
        in_specs=[pl.BlockSpec(memory_space=pltpu.MemorySpace.VMEM)
                  for _ in operands],
        out_specs=[pl.BlockSpec(memory_space=pltpu.MemorySpace.VMEM)
                   for _ in out_shape],
        cost_estimate=cost,
    )(*operands)

    # NCHW glue for the *returned* intermediates only (not on the compute
    # path): (3N, C) h-major -> PyTorch (N, C, 3, 1) / NCHW flatten.
    enc_h1 = jnp.transpose(h1_hm.reshape(H, N, e1), (1, 2, 0))[..., None]
    enc_h2 = jnp.transpose(h2_hm.reshape(H, N, e2), (1, 2, 0))[..., None]
    enc_h3 = jnp.transpose(h3_hm.reshape(H, N, e3), (1, 2, 0)).reshape(N, e3 * H)
    return x_bar, enc_h1, enc_h2, enc_h3, z


# ----------------------------- parameter setup --------------------------------

def init_params(key, n_enc_1, n_enc_2, n_enc_3, n_dec_1, n_dec_2, n_dec_3,
                n_input, n_z):
    assert n_input == 3, "forward() hardcodes x.view(-1, 1, 3, 1) => n_input == 3"
    ks = list(jax.random.split(key, 16))

    def uni(k, shape, fan_in):
        bound = 1.0 / (fan_in ** 0.5)
        return jax.random.uniform(k, shape, jnp.float32, -bound, bound)

    p = {}
    # encoder 1x1 convs, stored directly as (Cin, Cout) matmul weights.
    # NOTE: conv biases exist (module fidelity / reference path) but the fused
    # Pallas kernel does not consume them -- they are exactly cancelled by the
    # following training-mode BatchNorm mean subtraction.
    p["enc1_w"] = uni(ks[0], (1, n_enc_1), 1)
    p["enc1_b"] = uni(ks[1], (n_enc_1,), 1)
    p["enc2_w"] = uni(ks[2], (n_enc_1, n_enc_2), n_enc_1)
    p["enc2_b"] = uni(ks[3], (n_enc_2,), n_enc_1)
    p["enc3_w"] = uni(ks[4], (n_enc_2, n_enc_3), n_enc_2)
    p["enc3_b"] = uni(ks[5], (n_enc_3,), n_enc_2)
    # z linear: (n_enc_3 * n_input, n_z)
    p["z_w"] = uni(ks[6], (n_enc_3 * n_input, n_z), n_enc_3 * n_input)
    p["z_b"] = uni(ks[7], (n_z,), n_enc_3 * n_input)
    # decoder 1x1 convs
    p["dec1_w"] = uni(ks[8], (n_z, n_dec_1), n_z)
    p["dec1_b"] = uni(ks[9], (n_dec_1,), n_z)
    p["dec2_w"] = uni(ks[10], (n_dec_1, n_dec_2), n_dec_1)
    p["dec2_b"] = uni(ks[11], (n_dec_2,), n_dec_1)
    p["dec3_w"] = uni(ks[12], (n_dec_2, n_dec_3), n_dec_2)
    p["dec3_b"] = uni(ks[13], (n_dec_3,), n_dec_2)
    # reconstruction linear: (n_dec_3, n_input)
    p["xbar_w"] = uni(ks[14], (n_dec_3, n_input), n_dec_3)
    p["xbar_b"] = uni(ks[15], (n_input,), n_dec_3)
    # BatchNorm affine params (PyTorch default init: gamma=1, beta=0)
    for name, c in [("bn_e1", n_enc_1), ("bn_e2", n_enc_2), ("bn_e3", n_enc_3),
                    ("bn_d1", n_dec_1), ("bn_d2", n_dec_2), ("bn_d3", n_dec_3)]:
        p[name + "_g"] = jnp.ones((c,), jnp.float32)
        p[name + "_b"] = jnp.zeros((c,), jnp.float32)
    return p


# --------------------------- pure-JAX reference --------------------------------

def ae_forward_ref(x, p):
    """Plain-JAX mirror of the PyTorch module (including conv biases)."""
    N = x.shape[0]
    t = x.reshape(N, 1, H, 1)

    def conv_bn_relu(t, w, b, g, be):
        y = jnp.einsum("nihw,io->nohw", t, w) + b[None, :, None, None]
        mean = jnp.mean(y, axis=(0, 2, 3), keepdims=True)
        var = jnp.mean((y - mean) ** 2, axis=(0, 2, 3), keepdims=True)
        yh = (y - mean) / jnp.sqrt(var + EPS)
        return jnp.maximum(yh * g[None, :, None, None] + be[None, :, None, None], 0.0)

    h1 = conv_bn_relu(t, p["enc1_w"], p["enc1_b"], p["bn_e1_g"], p["bn_e1_b"])
    h2 = conv_bn_relu(h1, p["enc2_w"], p["enc2_b"], p["bn_e2_g"], p["bn_e2_b"])
    h3 = conv_bn_relu(h2, p["enc3_w"], p["enc3_b"], p["bn_e3_g"], p["bn_e3_b"])
    h3f = h3.reshape(N, -1)
    z = h3f @ p["z_w"] + p["z_b"]
    zr = z.reshape(N, -1, 1, 1)
    d1 = conv_bn_relu(zr, p["dec1_w"], p["dec1_b"], p["bn_d1_g"], p["bn_d1_b"])
    d2 = conv_bn_relu(d1, p["dec2_w"], p["dec2_b"], p["bn_d2_g"], p["bn_d2_b"])
    d3 = conv_bn_relu(d2, p["dec3_w"], p["dec3_b"], p["bn_d3_g"], p["bn_d3_b"])
    x_bar = d3.reshape(N, -1) @ p["xbar_w"] + p["xbar_b"]
    return x_bar, h1, h2, h3f, z


# ----------------------------------- main --------------------------------------

if __name__ == "__main__":
    # small sizes consistent with the module (n_input must be 3)
    n_enc_1, n_enc_2, n_enc_3 = 8, 16, 32
    n_dec_1, n_dec_2, n_dec_3 = 32, 16, 8
    n_input, n_z = 3, 4
    N = 8

    key = jax.random.PRNGKey(0)
    k_x, k_p = jax.random.split(key)
    x = jax.random.normal(k_x, (N, n_input), jnp.float32)
    params = init_params(k_p, n_enc_1, n_enc_2, n_enc_3,
                         n_dec_1, n_dec_2, n_dec_3, n_input, n_z)

    outs = jax.jit(ae_forward)(x, params)
    outs = jax.block_until_ready(outs)

    x_bar, enc_h1, enc_h2, enc_h3, z = outs
    assert x_bar.shape == (N, n_input)
    assert enc_h1.shape == (N, n_enc_1, 3, 1)
    assert enc_h2.shape == (N, n_enc_2, 3, 1)
    assert enc_h3.shape == (N, n_enc_3 * 3)
    assert z.shape == (N, n_z)

    # numerical check against the pure-JAX reference of the PyTorch forward
    refs = ae_forward_ref(x, params)
    for name, got, want in zip(("x_bar", "enc_h1", "enc_h2", "enc_h3", "z"),
                               outs, refs):
        assert got.shape == want.shape, (name, got.shape, want.shape)
        err = float(jnp.max(jnp.abs(got - want)))
        assert bool(jnp.allclose(got, want, rtol=2e-2, atol=2e-2)), (name, err)

    print("KERNEL_OK")
</pallas_src>

<mosaic_0001>
module attributes {stable_mosaic.version = 11 : i64} {
  func.func @kernel(%arg0: memref<24x1xf32, #tpu.memory_space<vmem>>, %arg1: memref<1x8xf32, #tpu.memory_space<vmem>>, %arg2: memref<8x16xf32, #tpu.memory_space<vmem>>, %arg3: memref<16x32xf32, #tpu.memory_space<vmem>>, %arg4: memref<3x32x4xf32, #tpu.memory_space<vmem>>, %arg5: memref<4x32xf32, #tpu.memory_space<vmem>>, %arg6: memref<32x16xf32, #tpu.memory_space<vmem>>, %arg7: memref<16x8xf32, #tpu.memory_space<vmem>>, %arg8: memref<8x3xf32, #tpu.memory_space<vmem>>, %arg9: memref<2x112xf32, #tpu.memory_space<vmem>>, %arg10: memref<1x7xf32, #tpu.memory_space<vmem>>, %arg11: memref<24x8xf32, #tpu.memory_space<vmem>>, %arg12: memref<24x16xf32, #tpu.memory_space<vmem>>, %arg13: memref<24x32xf32, #tpu.memory_space<vmem>>, %arg14: memref<8x4xf32, #tpu.memory_space<vmem>>, %arg15: memref<8x3xf32, #tpu.memory_space<vmem>>) attributes {dimension_semantics = [], scalar_prefetch = 0 : i64, scratch_operands = 0 : i64, tpu.core_type = #tpu.core_type<tc>} {
    %c0 = arith.constant 0 : index
    %c0_0 = arith.constant 0 : index
    %0 = vector.load %arg9[%c0, %c0_0] : memref<2x112xf32, #tpu.memory_space<vmem>>, vector<2x112xf32>
    %c0_1 = arith.constant 0 : index
    %c0_2 = arith.constant 0 : index
    %1 = vector.load %arg0[%c0_1, %c0_2] : memref<24x1xf32, #tpu.memory_space<vmem>>, vector<24x1xf32>
    %2 = vector.extract_strided_slice %0 {offsets = [0, 0], sizes = [1, 8], strides = [1, 1]} : vector<2x112xf32> to vector<1x8xf32>
    %3 = vector.extract_strided_slice %0 {offsets = [1, 0], sizes = [1, 8], strides = [1, 1]} : vector<2x112xf32> to vector<1x8xf32>
    %c0_3 = arith.constant 0 : index
    %c0_4 = arith.constant 0 : index
    %4 = vector.load %arg1[%c0_3, %c0_4] : memref<1x8xf32, #tpu.memory_space<vmem>>, vector<1x8xf32>
    %5 = vector.broadcast %1 : vector<24x1xf32> to vector<24x8xf32>
    %6 = vector.broadcast %4 : vector<1x8xf32> to vector<24x8xf32>
    %7 = arith.mulf %5, %6 : vector<24x8xf32>
    %cst = arith.constant dense<0.000000e+00> : vector<8xf32>
    %8 = vector.multi_reduction <add>, %7, %cst [0] : vector<24x8xf32> to vector<8xf32>
    %9 = vector.shape_cast %8 : vector<8xf32> to vector<1x8xf32>
    %10 = arith.mulf %7, %7 : vector<24x8xf32>
    %cst_5 = arith.constant dense<0.000000e+00> : vector<8xf32>
    %11 = vector.multi_reduction <add>, %10, %cst_5 [0] : vector<24x8xf32> to vector<8xf32>
    %12 = vector.shape_cast %11 : vector<8xf32> to vector<1x8xf32>
    %cst_6 = arith.constant 0.0416666679 : f32
    %13 = vector.broadcast %cst_6 : f32 to vector<1x8xf32>
    %14 = arith.mulf %9, %13 : vector<1x8xf32>
    %cst_7 = arith.constant 0.0416666679 : f32
    %15 = vector.broadcast %cst_7 : f32 to vector<1x8xf32>
    %16 = arith.mulf %12, %15 : vector<1x8xf32>
    %17 = arith.mulf %14, %14 : vector<1x8xf32>
    %18 = arith.subf %16, %17 : vector<1x8xf32>
    %cst_8 = arith.constant 0.000000e+00 : f32
    %19 = vector.broadcast %cst_8 : f32 to vector<1x8xf32>
    %20 = arith.maximumf %18, %19 : vector<1x8xf32>
    %cst_9 = arith.constant 9.99999974E-6 : f32
    %21 = vector.broadcast %cst_9 : f32 to vector<1x8xf32>
    %22 = arith.addf %20, %21 : vector<1x8xf32>
    %23 = math.rsqrt %22 : vector<1x8xf32>
    %24 = arith.mulf %2, %23 : vector<1x8xf32>
    %25 = arith.mulf %14, %24 : vector<1x8xf32>
    %26 = arith.subf %3, %25 : vector<1x8xf32>
    %27 = vector.broadcast %24 : vector<1x8xf32> to vector<24x8xf32>
    %28 = arith.mulf %7, %27 : vector<24x8xf32>
    %29 = vector.broadcast %26 : vector<1x8xf32> to vector<24x8xf32>
    %30 = arith.addf %28, %29 : vector<24x8xf32>
    %cst_10 = arith.constant 0.000000e+00 : f32
    %31 = vector.broadcast %cst_10 : f32 to vector<24x8xf32>
    %32 = arith.maximumf %30, %31 : vector<24x8xf32>
    %33 = vector.extract_strided_slice %0 {offsets = [0, 8], sizes = [1, 16], strides = [1, 1]} : vector<2x112xf32> to vector<1x16xf32>
    %34 = vector.extract_strided_slice %0 {offsets = [1, 8], sizes = [1, 16], strides = [1, 1]} : vector<2x112xf32> to vector<1x16xf32>
    %c0_11 = arith.constant 0 : index
    %c0_12 = arith.constant 0 : index
    %35 = vector.load %arg2[%c0_11, %c0_12] : memref<8x16xf32, #tpu.memory_space<vmem>>, vector<8x16xf32>
    %cst_13 = arith.constant dense<0.000000e+00> : vector<24x16xf32>
    %36 = tpu.matmul %32, %35, %cst_13 {dimension_numbers = #tpu.dot_dimension_numbers<[1], [0], [0], [1], [0, 0, 1, 1], [], []>} : vector<24x8xf32>, vector<8x16xf32>, vector<24x16xf32> -> vector<24x16xf32>
    %cst_14 = arith.constant dense<0.000000e+00> : vector<16xf32>
    %37 = vector.multi_reduction <add>, %36, %cst_14 [0] : vector<24x16xf32> to vector<16xf32>
    %38 = vector.shape_cast %37 : vector<16xf32> to vector<1x16xf32>
    %39 = arith.mulf %36, %36 : vector<24x16xf32>
    %cst_15 = arith.constant dense<0.000000e+00> : vector<16xf32>
    %40 = vector.multi_reduction <add>, %39, %cst_15 [0] : vector<24x16xf32> to vector<16xf32>
    %41 = vector.shape_cast %40 : vector<16xf32> to vector<1x16xf32>
    %cst_16 = arith.constant 0.0416666679 : f32
    %42 = vector.broadcast %cst_16 : f32 to vector<1x16xf32>
    %43 = arith.mulf %38, %42 : vector<1x16xf32>
    %cst_17 = arith.constant 0.0416666679 : f32
    %44 = vector.broadcast %cst_17 : f32 to vector<1x16xf32>
    %45 = arith.mulf %41, %44 : vector<1x16xf32>
    %46 = arith.mulf %43, %43 : vector<1x16xf32>
    %47 = arith.subf %45, %46 : vector<1x16xf32>
    %cst_18 = arith.constant 0.000000e+00 : f32
    %48 = vector.broadcast %cst_18 : f32 to vector<1x16xf32>
    %49 = arith.maximumf %47, %48 : vector<1x16xf32>
    %cst_19 = arith.constant 9.99999974E-6 : f32
    %50 = vector.broadcast %cst_19 : f32 to vector<1x16xf32>
    %51 = arith.addf %49, %50 : vector<1x16xf32>
    %52 = math.rsqrt %51 : vector<1x16xf32>
    %53 = arith.mulf %33, %52 : vector<1x16xf32>
    %54 = arith.mulf %43, %53 : vector<1x16xf32>
    %55 = arith.subf %34, %54 : vector<1x16xf32>
    %56 = vector.broadcast %53 : vector<1x16xf32> to vector<24x16xf32>
    %57 = arith.mulf %36, %56 : vector<24x16xf32>
    %58 = vector.broadcast %55 : vector<1x16xf32> to vector<24x16xf32>
    %59 = arith.addf %57, %58 : vector<24x16xf32>
    %cst_20 = arith.constant 0.000000e+00 : f32
    %60 = vector.broadcast %cst_20 : f32 to vector<24x16xf32>
    %61 = arith.maximumf %59, %60 : vector<24x16xf32>
    %62 = vector.extract_strided_slice %0 {offsets = [0, 24], sizes = [1, 32], strides = [1, 1]} : vector<2x112xf32> to vector<1x32xf32>
    %63 = vector.extract_strided_slice %0 {offsets = [1, 24], sizes = [1, 32], strides = [1, 1]} : vector<2x112xf32> to vector<1x32xf32>
    %c0_21 = arith.constant 0 : index
    %c0_22 = arith.constant 0 : index
    %64 = vector.load %arg3[%c0_21, %c0_22] : memref<16x32xf32, #tpu.memory_space<vmem>>, vector<16x32xf32>
    %cst_23 = arith.constant dense<0.000000e+00> : vector<24x32xf32>
    %65 = tpu.matmul %61, %64, %cst_23 {dimension_numbers = #tpu.dot_dimension_numbers<[1], [0], [0], [1], [0, 0, 1, 1], [], []>} : vector<24x16xf32>, vector<16x32xf32>, vector<24x32xf32> -> vector<24x32xf32>
    %cst_24 = arith.constant dense<0.000000e+00> : vector<32xf32>
    %66 = vector.multi_reduction <add>, %65, %cst_24 [0] : vector<24x32xf32> to vector<32xf32>
    %67 = vector.shape_cast %66 : vector<32xf32> to vector<1x32xf32>
    %68 = arith.mulf %65, %65 : vector<24x32xf32>
    %cst_25 = arith.constant dense<0.000000e+00> : vector<32xf32>
    %69 = vector.multi_reduction <add>, %68, %cst_25 [0] : vector<24x32xf32> to vector<32xf32>
    %70 = vector.shape_cast %69 : vector<32xf32> to vector<1x32xf32>
    %cst_26 = arith.constant 0.0416666679 : f32
    %71 = vector.broadcast %cst_26 : f32 to vector<1x32xf32>
    %72 = arith.mulf %67, %71 : vector<1x32xf32>
    %cst_27 = arith.constant 0.0416666679 : f32
    %73 = vector.broadcast %cst_27 : f32 to vector<1x32xf32>
    %74 = arith.mulf %70, %73 : vector<1x32xf32>
    %75 = arith.mulf %72, %72 : vector<1x32xf32>
    %76 = arith.subf %74, %75 : vector<1x32xf32>
    %cst_28 = arith.constant 0.000000e+00 : f32
    %77 = vector.broadcast %cst_28 : f32 to vector<1x32xf32>
    %78 = arith.maximumf %76, %77 : vector<1x32xf32>
    %cst_29 = arith.constant 9.99999974E-6 : f32
    %79 = vector.broadcast %cst_29 : f32 to vector<1x32xf32>
    %80 = arith.addf %78, %79 : vector<1x32xf32>
    %81 = math.rsqrt %80 : vector<1x32xf32>
    %82 = arith.mulf %62, %81 : vector<1x32xf32>
    %83 = arith.mulf %72, %82 : vector<1x32xf32>
    %84 = arith.subf %63, %83 : vector<1x32xf32>
    %85 = vector.broadcast %82 : vector<1x32xf32> to vector<24x32xf32>
    %86 = arith.mulf %65, %85 : vector<24x32xf32>
    %87 = vector.broadcast %84 : vector<1x32xf32> to vector<24x32xf32>
    %88 = arith.addf %86, %87 : vector<24x32xf32>
    %cst_30 = arith.constant 0.000000e+00 : f32
    %89 = vector.broadcast %cst_30 : f32 to vector<24x32xf32>
    %90 = arith.maximumf %88, %89 : vector<24x32xf32>
    %c0_31 = arith.constant 0 : index
    %c0_32 = arith.constant 0 : index
    %91 = vector.load %arg11[%c0_31, %c0_32] : memref<24x8xf32, #tpu.memory_space<vmem>>, vector<24x8xf32>
    tpu.vector_store %arg11[%c0_31, %c0_32], %32 {strides = array<i32>} : memref<24x8xf32, #tpu.memory_space<vmem>>, vector<24x8xf32>,
    %c0_33 = arith.constant 0 : index
    %c0_34 = arith.constant 0 : index
    %92 = vector.load %arg12[%c0_33, %c0_34] : memref<24x16xf32, #tpu.memory_space<vmem>>, vector<24x16xf32>
    tpu.vector_store %arg12[%c0_33, %c0_34], %61 {strides = array<i32>} : memref<24x16xf32, #tpu.memory_space<vmem>>, vector<24x16xf32>,
    %c0_35 = arith.constant 0 : index
    %c0_36 = arith.constant 0 : index
    %93 = vector.load %arg13[%c0_35, %c0_36] : memref<24x32xf32, #tpu.memory_space<vmem>>, vector<24x32xf32>
    tpu.vector_store %arg13[%c0_35, %c0_36], %90 {strides = array<i32>} : memref<24x32xf32, #tpu.memory_space<vmem>>, vector<24x32xf32>,
    %c0_37 = arith.constant 0 : index
    %c0_38 = arith.constant 0 : index
    %94 = vector.load %arg10[%c0_37, %c0_38] : memref<1x7xf32, #tpu.memory_space<vmem>>, vector<1x7xf32>
    %95 = vector.extract_strided_slice %94 {offsets = [0, 0], sizes = [1, 4], strides = [1, 1]} : vector<1x7xf32> to vector<1x4xf32>
    %96 = vector.extract_strided_slice %90 {offsets = [0, 0], sizes = [8, 32], strides = [1, 1]} : vector<24x32xf32> to vector<8x32xf32>
    %c0_39 = arith.constant 0 : index
    %c0_40 = arith.constant 0 : index
    %c0_41 = arith.constant 0 : index
    %97 = vector.load %arg4[%c0_39, %c0_40, %c0_41] : memref<3x32x4xf32, #tpu.memory_space<vmem>>, vector<1x32x4xf32>
    %98 = vector.shape_cast %97 : vector<1x32x4xf32> to vector<32x4xf32>
    %cst_42 = arith.constant dense<0.000000e+00> : vector<8x4xf32>
    %99 = tpu.matmul %96, %98, %cst_42 {dimension_numbers = #tpu.dot_dimension_numbers<[1], [0], [0], [1], [0, 0, 1, 1], [], []>} : vector<8x32xf32>, vector<32x4xf32>, vector<8x4xf32> -> vector<8x4xf32>
    %100 = vector.broadcast %95 : vector<1x4xf32> to vector<8x4xf32>
    %101 = arith.addf %100, %99 : vector<8x4xf32>
    %102 = vector.extract_strided_slice %90 {offsets = [8, 0], sizes = [8, 32], strides = [1, 1]} : vector<24x32xf32> to vector<8x32xf32>
    %c1 = arith.constant 1 : index
    %c0_43 = arith.constant 0 : index
    %c0_44 = arith.constant 0 : index
    %103 = vector.load %arg4[%c1, %c0_43, %c0_44] : memref<3x32x4xf32, #tpu.memory_space<vmem>>, vector<1x32x4xf32>
    %104 = vector.shape_cast %103 : vector<1x32x4xf32> to vector<32x4xf32>
    %cst_45 = arith.constant dense<0.000000e+00> : vector<8x4xf32>
    %105 = tpu.matmul %102, %104, %cst_45 {dimension_numbers = #tpu.dot_dimension_numbers<[1], [0], [0], [1], [0, 0, 1, 1], [], []>} : vector<8x32xf32>, vector<32x4xf32>, vector<8x4xf32> -> vector<8x4xf32>
    %106 = arith.addf %101, %105 : vector<8x4xf32>
    %107 = vector.extract_strided_slice %90 {offsets = [16, 0], sizes = [8, 32], strides = [1, 1]} : vector<24x32xf32> to vector<8x32xf32>
    %c2 = arith.constant 2 : index
    %c0_46 = arith.constant 0 : index
    %c0_47 = arith.constant 0 : index
    %108 = vector.load %arg4[%c2, %c0_46, %c0_47] : memref<3x32x4xf32, #tpu.memory_space<vmem>>, vector<1x32x4xf32>
    %109 = vector.shape_cast %108 : vector<1x32x4xf32> to vector<32x4xf32>
    %cst_48 = arith.constant dense<0.000000e+00> : vector<8x4xf32>
    %110 = tpu.matmul %107, %109, %cst_48 {dimension_numbers = #tpu.dot_dimension_numbers<[1], [0], [0], [1], [0, 0, 1, 1], [], []>} : vector<8x32xf32>, vector<32x4xf32>, vector<8x4xf32> -> vector<8x4xf32>
    %111 = arith.addf %106, %110 : vector<8x4xf32>
    %c0_49 = arith.constant 0 : index
    %c0_50 = arith.constant 0 : index
    %112 = vector.load %arg14[%c0_49, %c0_50] : memref<8x4xf32, #tpu.memory_space<vmem>>, vector<8x4xf32>
    tpu.vector_store %arg14[%c0_49, %c0_50], %111 {strides = array<i32>} : memref<8x4xf32, #tpu.memory_space<vmem>>, vector<8x4xf32>,
    %113 = vector.extract_strided_slice %0 {offsets = [0, 56], sizes = [1, 32], strides = [1, 1]} : vector<2x112xf32> to vector<1x32xf32>
    %114 = vector.extract_strided_slice %0 {offsets = [1, 56], sizes = [1, 32], strides = [1, 1]} : vector<2x112xf32> to vector<1x32xf32>
    %c0_51 = arith.constant 0 : index
    %c0_52 = arith.constant 0 : index
    %115 = vector.load %arg5[%c0_51, %c0_52] : memref<4x32xf32, #tpu.memory_space<vmem>>, vector<4x32xf32>
    %cst_53 = arith.constant dense<0.000000e+00> : vector<8x32xf32>
    %116 = tpu.matmul %111, %115, %cst_53 {dimension_numbers = #tpu.dot_dimension_numbers<[1], [0], [0], [1], [0, 0, 1, 1], [], []>} : vector<8x4xf32>, vector<4x32xf32>, vector<8x32xf32> -> vector<8x32xf32>
    %cst_54 = arith.constant dense<0.000000e+00> : vector<32xf32>
    %117 = vector.multi_reduction <add>, %116, %cst_54 [0] : vector<8x32xf32> to vector<32xf32>
    %118 = vector.shape_cast %117 : vector<32xf32> to vector<1x32xf32>
    %119 = arith.mulf %116, %116 : vector<8x32xf32>
    %cst_55 = arith.constant dense<0.000000e+00> : vector<32xf32>
    %120 = vector.multi_reduction <add>, %119, %cst_55 [0] : vector<8x32xf32> to vector<32xf32>
    %121 = vector.shape_cast %120 : vector<32xf32> to vector<1x32xf32>
    %cst_56 = arith.constant 1.250000e-01 : f32
    %122 = vector.broadcast %cst_56 : f32 to vector<1x32xf32>
    %123 = arith.mulf %118, %122 : vector<1x32xf32>
    %cst_57 = arith.constant 1.250000e-01 : f32
    %124 = vector.broadcast %cst_57 : f32 to vector<1x32xf32>
    %125 = arith.mulf %121, %124 : vector<1x32xf32>
    %126 = arith.mulf %123, %123 : vector<1x32xf32>
    %127 = arith.subf %125, %126 : vector<1x32xf32>
    %cst_58 = arith.constant 0.000000e+00 : f32
    %128 = vector.broadcast %cst_58 : f32 to vector<1x32xf32>
    %129 = arith.maximumf %127, %128 : vector<1x32xf32>
    %cst_59 = arith.constant 9.99999974E-6 : f32
    %130 = vector.broadcast %cst_59 : f32 to vector<1x32xf32>
    %131 = arith.addf %129, %130 : vector<1x32xf32>
    %132 = math.rsqrt %131 : vector<1x32xf32>
    %133 = arith.mulf %113, %132 : vector<1x32xf32>
    %134 = arith.mulf %123, %133 : vector<1x32xf32>
    %135 = arith.subf %114, %134 : vector<1x32xf32>
    %136 = vector.broadcast %133 : vector<1x32xf32> to vector<8x32xf32>
    %137 = arith.mulf %116, %136 : vector<8x32xf32>
    %138 = vector.broadcast %135 : vector<1x32xf32> to vector<8x32xf32>
    %139 = arith.addf %137, %138 : vector<8x32xf32>
    %cst_60 = arith.constant 0.000000e+00 : f32
    %140 = vector.broadcast %cst_60 : f32 to vector<8x32xf32>
    %141 = arith.maximumf %139, %140 : vector<8x32xf32>
    %142 = vector.extract_strided_slice %0 {offsets = [0, 88], sizes = [1, 16], strides = [1, 1]} : vector<2x112xf32> to vector<1x16xf32>
    %143 = vector.extract_strided_slice %0 {offsets = [1, 88], sizes = [1, 16], strides = [1, 1]} : vector<2x112xf32> to vector<1x16xf32>
    %c0_61 = arith.constant 0 : index
    %c0_62 = arith.constant 0 : index
    %144 = vector.load %arg6[%c0_61, %c0_62] : memref<32x16xf32, #tpu.memory_space<vmem>>, vector<32x16xf32>
    %cst_63 = arith.constant dense<0.000000e+00> : vector<8x16xf32>
    %145 = tpu.matmul %141, %144, %cst_63 {dimension_numbers = #tpu.dot_dimension_numbers<[1], [0], [0], [1], [0, 0, 1, 1], [], []>} : vector<8x32xf32>, vector<32x16xf32>, vector<8x16xf32> -> vector<8x16xf32>
    %cst_64 = arith.constant dense<0.000000e+00> : vector<16xf32>
    %146 = vector.multi_reduction <add>, %145, %cst_64 [0] : vector<8x16xf32> to vector<16xf32>
    %147 = vector.shape_cast %146 : vector<16xf32> to vector<1x16xf32>
    %148 = arith.mulf %145, %145 : vector<8x16xf32>
    %cst_65 = arith.constant dense<0.000000e+00> : vector<16xf32>
    %149 = vector.multi_reduction <add>, %148, %cst_65 [0] : vector<8x16xf32> to vector<16xf32>
    %150 = vector.shape_cast %149 : vector<16xf32> to vector<1x16xf32>
    %cst_66 = arith.constant 1.250000e-01 : f32
    %151 = vector.broadcast %cst_66 : f32 to vector<1x16xf32>
    %152 = arith.mulf %147, %151 : vector<1x16xf32>
    %cst_67 = arith.constant 1.250000e-01 : f32
    %153 = vector.broadcast %cst_67 : f32 to vector<1x16xf32>
    %154 = arith.mulf %150, %153 : vector<1x16xf32>
    %155 = arith.mulf %152, %152 : vector<1x16xf32>
    %156 = arith.subf %154, %155 : vector<1x16xf32>
    %cst_68 = arith.constant 0.000000e+00 : f32
    %157 = vector.broadcast %cst_68 : f32 to vector<1x16xf32>
    %158 = arith.maximumf %156, %157 : vector<1x16xf32>
    %cst_69 = arith.constant 9.99999974E-6 : f32
    %159 = vector.broadcast %cst_69 : f32 to vector<1x16xf32>
    %160 = arith.addf %158, %159 : vector<1x16xf32>
    %161 = math.rsqrt %160 : vector<1x16xf32>
    %162 = arith.mulf %142, %161 : vector<1x16xf32>
    %163 = arith.mulf %152, %162 : vector<1x16xf32>
    %164 = arith.subf %143, %163 : vector<1x16xf32>
    %165 = vector.broadcast %162 : vector<1x16xf32> to vector<8x16xf32>
    %166 = arith.mulf %145, %165 : vector<8x16xf32>
    %167 = vector.broadcast %164 : vector<1x16xf32> to vector<8x16xf32>
    %168 = arith.addf %166, %167 : vector<8x16xf32>
    %cst_70 = arith.constant 0.000000e+00 : f32
    %169 = vector.broadcast %cst_70 : f32 to vector<8x16xf32>
    %170 = arith.maximumf %168, %169 : vector<8x16xf32>
    %171 = vector.extract_strided_slice %0 {offsets = [0, 104], sizes = [1, 8], strides = [1, 1]} : vector<2x112xf32> to vector<1x8xf32>
    %172 = vector.extract_strided_slice %0 {offsets = [1, 104], sizes = [1, 8], strides = [1, 1]} : vector<2x112xf32> to vector<1x8xf32>
    %c0_71 = arith.constant 0 : index
    %c0_72 = arith.constant 0 : index
    %173 = vector.load %arg7[%c0_71, %c0_72] : memref<16x8xf32, #tpu.memory_space<vmem>>, vector<16x8xf32>
    %cst_73 = arith.constant dense<0.000000e+00> : vector<8x8xf32>
    %174 = tpu.matmul %170, %173, %cst_73 {dimension_numbers = #tpu.dot_dimension_numbers<[1], [0], [0], [1], [0, 0, 1, 1], [], []>} : vector<8x16xf32>, vector<16x8xf32>, vector<8x8xf32> -> vector<8x8xf32>
    %cst_74 = arith.constant dense<0.000000e+00> : vector<8xf32>
    %175 = vector.multi_reduction <add>, %174, %cst_74 [0] : vector<8x8xf32> to vector<8xf32>
    %176 = vector.shape_cast %175 : vector<8xf32> to vector<1x8xf32>
    %177 = arith.mulf %174, %174 : vector<8x8xf32>
    %cst_75 = arith.constant dense<0.000000e+00> : vector<8xf32>
    %178 = vector.multi_reduction <add>, %177, %cst_75 [0] : vector<8x8xf32> to vector<8xf32>
    %179 = vector.shape_cast %178 : vector<8xf32> to vector<1x8xf32>
    %cst_76 = arith.constant 1.250000e-01 : f32
    %180 = vector.broadcast %cst_76 : f32 to vector<1x8xf32>
    %181 = arith.mulf %176, %180 : vector<1x8xf32>
    %cst_77 = arith.constant 1.250000e-01 : f32
    %182 = vector.broadcast %cst_77 : f32 to vector<1x8xf32>
    %183 = arith.mulf %179, %182 : vector<1x8xf32>
    %184 = arith.mulf %181, %181 : vector<1x8xf32>
    %185 = arith.subf %183, %184 : vector<1x8xf32>
    %cst_78 = arith.constant 0.000000e+00 : f32
    %186 = vector.broadcast %cst_78 : f32 to vector<1x8xf32>
    %187 = arith.maximumf %185, %186 : vector<1x8xf32>
    %cst_79 = arith.constant 9.99999974E-6 : f32
    %188 = vector.broadcast %cst_79 : f32 to vector<1x8xf32>
    %189 = arith.addf %187, %188 : vector<1x8xf32>
    %190 = math.rsqrt %189 : vector<1x8xf32>
    %191 = arith.mulf %171, %190 : vector<1x8xf32>
    %192 = arith.mulf %181, %191 : vector<1x8xf32>
    %193 = arith.subf %172, %192 : vector<1x8xf32>
    %194 = vector.broadcast %191 : vector<1x8xf32> to vector<8x8xf32>
    %195 = arith.mulf %174, %194 : vector<8x8xf32>
    %196 = vector.broadcast %193 : vector<1x8xf32> to vector<8x8xf32>
    %197 = arith.addf %195, %196 : vector<8x8xf32>
    %cst_80 = arith.constant 0.000000e+00 : f32
    %198 = vector.broadcast %cst_80 : f32 to vector<8x8xf32>
    %199 = arith.maximumf %197, %198 : vector<8x8xf32>
    %c0_81 = arith.constant 0 : index
    %c0_82 = arith.constant 0 : index
    %200 = vector.load %arg8[%c0_81, %c0_82] : memref<8x3xf32, #tpu.memory_space<vmem>>, vector<8x3xf32>
    %cst_83 = arith.constant dense<0.000000e+00> : vector<8x3xf32>
    %201 = tpu.matmul %199, %200, %cst_83 {dimension_numbers = #tpu.dot_dimension_numbers<[1], [0], [0], [1], [0, 0, 1, 1], [], []>} : vector<8x8xf32>, vector<8x3xf32>, vector<8x3xf32> -> vector<8x3xf32>
    %202 = vector.extract_strided_slice %94 {offsets = [0, 4], sizes = [1, 3], strides = [1, 1]} : vector<1x7xf32> to vector<1x3xf32>
    %203 = vector.broadcast %202 : vector<1x3xf32> to vector<8x3xf32>
    %204 = arith.addf %201, %203 : vector<8x3xf32>
    %c0_84 = arith.constant 0 : index
    %c0_85 = arith.constant 0 : index
    %205 = vector.load %arg15[%c0_84, %c0_85] : memref<8x3xf32, #tpu.memory_space<vmem>>, vector<8x3xf32>
    tpu.vector_store %arg15[%c0_84, %c0_85], %204 {strides = array<i32>} : memref<8x3xf32, #tpu.memory_space<vmem>>, vector<8x3xf32>,
    return
  }
}

</mosaic_0001>

<bundles_post_ra>
// kernel: ae_forward.1
= control target key start
LH: loop header
LB: loop body
LE: loop exit
PB: predicated region body
PF: predicated region fallthrough
CT: control target
= control target key end

     0   :  { %v1418_v0 = vmov 0   ;;  %v1419_v4 = vmov 0.0   ;;  %vm1420_vm0 = vmmov 0   ;;  %vm72_vm1 = vcmask 64512   ;;  %s1422_s17 = smov 120   ;;  %s1425_s27 = smov 104   ;;  %s1783_s0 = inlined_call_operand.vmem [shape: f32[24,1], index: 0, kind: input, shape index: {}]   ;;  %s1784_s2 = inlined_call_operand.vmem [shape: f32[8,16], index: 2, kind: input, shape index: {}]   ;;  %s1785_s1 = inlined_call_operand.vmem [shape: f32[1,8], index: 1, kind: input, shape index: {}]   ;;  %s1786_s9 = inlined_call_operand.vmem [shape: f32[2,112], index: 9, kind: input, shape index: {}]   ;;  %s1787_s11 = inlined_call_operand.vmem [shape: f32[24,8], index: 11, kind: output, shape index: {0}]   ;;  %s1788_s3 = inlined_call_operand.vmem [shape: f32[16,32], index: 3, kind: input, shape index: {}]   ;;  %s1789_s12 = inlined_call_operand.vmem [shape: f32[24,16], index: 12, kind: output, shape index: {1}]   ;;  %s1790_s4 = inlined_call_operand.vmem [shape: f32[3,32,4], index: 4, kind: input, shape index: {}]   ;;  %s1791_s5 = inlined_call_operand.vmem [shape: f32[4,32], index: 5, kind: input, shape index: {}]   ;;  %s1792_s13 = inlined_call_operand.vmem [shape: f32[24,32], index: 13, kind: output, shape index: {2}]   ;;  %s1793_s10 = inlined_call_operand.vmem [shape: f32[1,7], index: 10, kind: input, shape index: {}]   ;;  %s1794_s14 = inlined_call_operand.vmem [shape: f32[8,4], index: 14, kind: output, shape index: {3}]   ;;  %s1795_s6 = inlined_call_operand.vmem [shape: f32[32,16], index: 6, kind: input, shape index: {}]   ;;  %s1796_s7 = inlined_call_operand.vmem [shape: f32[16,8], index: 7, kind: input, shape index: {}]   ;;  %s1797_s8 = inlined_call_operand.vmem [shape: f32[8,3], index: 8, kind: input, shape index: {}]   ;;  %s1798_s15 = inlined_call_operand.vmem [shape: f32[8,3], index: 15, kind: output, shape index: {4}]  }
   0x1   :  { %1404 = vset.pattern.permute.xlu0 %v1418_v0  ;;  %v44_v1 = vld [vmem:[%s1783_s0] sm:$0xff]  ;;  %1405 = vset.pattern.permute.xlu1 %v1418_v0  ;;  %v46_v2 = vld [vmem:[%s1783_s0 + $0x10] sm:$0xff]  ;;  %v45_v3 = vld [vmem:[%s1783_s0 + $0x8] sm:$0xff]  ;;  %v111_v44 = vlaneseq  ;;  %vm218_vm2 = vcmask 130048   ;;  %vm383_vm3 = vcmask 261120   ;;  %vm715_vm4 = vcmask 1043456  }
   0x2   :  { %50 = vperm.xlu0 %1404, %v44_v1   ;;  %60 = vperm.xlu1 %1405, %v46_v2   ;;  %v128_v5 = vld [vmem:[%s1784_s2] sm:$0xff]  ;;  %vm709_vm5 = vcmask 31744   ;;  %s1429_s0 = smov 40   ;;  %s1430_s30 = smov 124   ;;  %vm1189_vm6 = vcmask 23552  }
   0x3   :  { %1271 = vmatprep.subr.mxu0 %v1419_v4  ;;  %1273 = vmatprep.mubr.msk.f32.mxu0 %vm1420_vm0, %v1419_v4  ;;  %v1211_v6 = vld [vmem:[%s1785_s1] ss:$0 sm:$0xff]  ;;  %v112_v45 = vshrl.u32 %v111_v44, 7 }
   0x4   :  { %1272 = vmatpush3.msra.mxu0 %v128_v5  ;;  %1286 = vmatprep.mubr.msk.f32.mxu1 %vm1420_vm0, %v1419_v4  ;;  %v1540_v46 = vld [vmem:[%s1786_s9] sm:$0x3] }
   0x5   :  { %v1542_v48 = vsub.s32 0, %v112_v45  ;;  %v1545_v51 = vsub.s32 1, %v112_v45 }
   0x6   :  { %55 = vperm.xlu0 %1404, %v45_v3  }
  0x81   :  { %v51_v7 = vpop.permute.xlu0 %50  ;;  %v61_v8 = vpop.permute.xlu1 %60 }
  0x82   :  { %v69_v9 = vmul.f32 %v1211_v6, %v51_v7  ;;  %v71_v10 = vmul.f32 %v1211_v6, %v61_v8 }
  0x84   :  { %v84_v12 = vmul.f32 %v69_v9, %v69_v9  ;;  %v86_v14 = vmul.f32 %v71_v10, %v71_v10  ;;  %v73_v15 = vsel %vm72_vm1, %v69_v9, 0.0  ;;  %v76_v18 = vsel %vm72_vm1, %v71_v10, 0.0 }
  0x85   :  { %v56_v11 = vpop.permute.xlu0 %55 }
  0x86   :  { %v70_v13 = vmul.f32 %v1211_v6, %v56_v11  ;;  %v87_v20 = vsel %vm72_vm1, %v84_v12, 0.0  ;;  %v90_v22 = vsel %vm72_vm1, %v86_v14, 0.0 }
  0x88   :  { %v74_v16 = vsel %vm72_vm1, %v70_v13, 0.0  ;;  %v85_v17 = vmul.f32 %v70_v13, %v70_v13 }
  0x89   :  { %v75_v19 = vadd.f32 %v74_v16, %v73_v15 }
  0x8a   :  { %v88_v21 = vsel %vm72_vm1, %v85_v17, 0.0 }
  0x8b   :  { %v89_v23 = vadd.f32 %v88_v21, %v87_v20  ;;  %v77_v24 = vadd.f32 %v76_v18, %v75_v19 }
  0x8d   :  { %v78_v25 = vrot.slane %v77_v24, 4  ;;  %v91_v26 = vadd.f32 %v90_v22, %v89_v23 }
  0x8f   :  { %v79_v27 = vadd.f32 %v78_v25, %v77_v24  ;;  %v92_v28 = vrot.slane %v91_v26, 4 }
  0x91   :  { %v80_v29 = vrot.slane %v79_v27, 2  ;;  %v93_v30 = vadd.f32 %v92_v28, %v91_v26 }
  0x93   :  { %v81_v31 = vadd.f32 %v80_v29, %v79_v27  ;;  %v94_v32 = vrot.slane %v93_v30, 2 }
  0x95   :  { %v82_v33 = vrot.slane %v81_v31, 1  ;;  %v95_v34 = vadd.f32 %v94_v32, %v93_v30 }
  0x97   :  { %v83_v35 = vadd.f32 %v82_v33, %v81_v31  ;;  %v96_v36 = vrot.slane %v95_v34, 1 }
  0x99   :  { %v97_v37 = vadd.f32 %v96_v36, %v95_v34  ;;  %v98_v38 = vmul.f32 0.041666668, %v83_v35 }
  0x9b   :  { %v99_v39 = vmul.f32 0.041666668, %v97_v37  ;;  %v100_v40 = vmul.f32 %v98_v38, %v98_v38 }
  0x9d   :  { %v101_v41 = vsub.f32 %v99_v39, %v100_v40 }
  0x9f   :  { %v102_v42 = vmax.f32 %v101_v41, 0.0 }
  0xa1   :  { %v103_v43 = vadd.f32 1e-05, %v102_v42 }
  0xa3   :  { %1406 = vrsqrt.f32 %v103_v43 }
  0xad   :  { %v1407_v47 = vpop.eup %1406 }
  0xae   :  { %v105_v49 = vmul.f32 %v1407_v47, %v1540_v46  ;;  %v292_v47 = vld [vmem:[%s1788_s3] sm:$0xff] }
  0xb0   :  { %v106_v50 = vmul.f32 %v105_v49, %v98_v38  ;;  %v114_v53 = vrot.slane %v105_v49, %v1542_v48  ;;  %v293_v49 = vld [vmem:[%s1788_s3 + $0x8] sm:$0xff] }
  0xb2   :  { %v108_v52 = vrot.slane %v106_v50, 7  ;;  %v117_v55 = vmul.f32 %v114_v53, %v71_v10  ;;  %v115_v57 = vmul.f32 %v114_v53, %v69_v9  ;;  %v116_v58 = vmul.f32 %v114_v53, %v70_v13 }
  0xb3   :  { %v1357_v50 = vpack.c.bf16 %v293_v49, %v292_v47  ;;  %v468_v47 = vld [vmem:[%s1790_s4 + $0x8] sm:$0xff]  ;;  %v469_v49 = vld [vmem:[%s1790_s4 + $0x10] sm:$0xff] }
  0xb4   :  { %v110_v54 = vsub.f32 %v1540_v46, %v108_v52  ;;  %v1423_v52 = vmov 0.0|0.0  }
  0xb5   :  { %1356 = vmatprep.subr.bf16.mxu1 %v1423_v52  ;;  %1359 = vmatprep.subr.bf16.mxu0 %v1423_v52 }
  0xb6   :  { %v121_v56 = vrot.slane %v110_v54, %v1545_v51  ;;  %1358 = vmatpush3.bf16.msra.mxu1 %v1357_v50 }
  0xb7   :  { %1328 = vmatprep.subr.mxu1 %v1419_v4 }
  0xb8   :  { %v124_v59 = vadd.f32 %v121_v56, %v117_v55  ;;  %v122_v60 = vadd.f32 %v121_v56, %v115_v57  ;;  %v123_v61 = vadd.f32 %v121_v56, %v116_v58 }
  0xba   :  { %v125_v62 = vmax.f32 %v122_v60, 0.0  ;;  %v126_v63 = vmax.f32 %v123_v61, 0.0  ;;  %v127_v0 = vmax.f32 %v124_v59, 0.0 }
  0xbc   :  { %1274 = vmatmul.mubr.msk.f32.vlgmr.msra.gmra.mrb[0].mxu0 %vm72_vm1, %v125_v62  ;;  %457 = vst.msk [vmem:[%s1787_s11] sm:$0xff] %vm72_vm1, %v125_v62  ;;  %458 = vst.msk [vmem:[%s1787_s11 + $0x8] sm:$0xff] %vm72_vm1, %v126_v63 }
  0xbd   :  { %459 = vst.msk [vmem:[%s1787_s11 + $0x10] sm:$0xff] %vm72_vm1, %v127_v0  ;;  %1276 = vmatprep.mubr.msk.f32.mxu0 %vm1420_vm0, %v1419_v4  ;;  %s1421_s11 = smov 8  }
  0xc0   :  { %1277 = vmatmul.mubr.msk.f32.gmra.mrb[2].mxu0 %vm72_vm1, %v126_v63 }
  0xc1   :  { %1279 = vmatprep.mubr.msk.f32.mxu0 %vm1420_vm0, %v1419_v4 }
  0xc4   :  { %1280 = vmatmul.mubr.msk.f32.gmra.mrb[4].mxu0 %vm72_vm1, %v127_v0 }
  0xc5   :  { %1303 = vmatprep.mubr.msk.f32.mxu0 %vm1420_vm0, %v1419_v4 }
 0x18f   :  { %v1571_v1 = vpop.f32.mrb[0].mxu0 }
 0x190   :  { %v1275_v2 = vpop.f32.mrb[1].mxu0  ;;  %v230_v3 = vmul.f32 %v1571_v1, %v1571_v1  ;;  %v219_v6 = vsel %vm218_vm2, %v1571_v1, 0.0 }
 0x192   :  { %v233_v11 = vsel %vm218_vm2, %v230_v3, 0.0 }
 0x193   :  { %v1575_v5 = vpop.f32.mrb[2].mxu0 }
 0x194   :  { %v220_v7 = vsel %vm218_vm2, %v1575_v5, 0.0  ;;  %v231_v8 = vmul.f32 %v1575_v5, %v1575_v5  ;;  %v1278_v9 = vpop.f32.mrb[3].mxu0 }
 0x195   :  { %v221_v10 = vadd.f32 %v220_v7, %v219_v6 }
 0x196   :  { %v234_v12 = vsel %vm218_vm2, %v231_v8, 0.0 }
 0x197   :  { %v235_v13 = vadd.f32 %v234_v12, %v233_v11  ;;  %v214_v14 = vpop.f32.mrb[4].mxu0 }
 0x198   :  { %v222_v15 = vsel %vm218_vm2, %v214_v14, 0.0  ;;  %v232_v16 = vmul.f32 %v214_v14, %v214_v14  ;;  %v1281_v17 = vpop.f32.mrb[5].mxu0 }
 0x199   :  { %v223_v18 = vadd.f32 %v222_v15, %v221_v10 }
 0x19a   :  { %v236_v19 = vsel %vm218_vm2, %v232_v16, 0.0 }
 0x19b   :  { %v224_v20 = vrot.slane %v223_v18, 4  ;;  %v237_v21 = vadd.f32 %v236_v19, %v235_v13 }
 0x19d   :  { %v225_v22 = vadd.f32 %v224_v20, %v223_v18  ;;  %v238_v23 = vrot.slane %v237_v21, 4 }
 0x19f   :  { %v226_v24 = vrot.slane %v225_v22, 2  ;;  %v239_v25 = vadd.f32 %v238_v23, %v237_v21 }
 0x1a1   :  { %v227_v26 = vadd.f32 %v226_v24, %v225_v22  ;;  %v240_v27 = vrot.slane %v239_v25, 2 }
 0x1a3   :  { %v228_v28 = vrot.slane %v227_v26, 1  ;;  %v241_v29 = vadd.f32 %v240_v27, %v239_v25 }
 0x1a5   :  { %v229_v30 = vadd.f32 %v228_v28, %v227_v26  ;;  %v242_v31 = vrot.slane %v241_v29, 1 }
 0x1a7   :  { %v243_v32 = vadd.f32 %v242_v31, %v241_v29  ;;  %v244_v33 = vmul.f32 0.041666668, %v229_v30 }
 0x1a9   :  { %v245_v34 = vmul.f32 0.041666668, %v243_v32  ;;  %v246_v35 = vmul.f32 %v244_v33, %v244_v33 }
 0x1ab   :  { %v247_v36 = vsub.f32 %v245_v34, %v246_v35 }
 0x1ad   :  { %v248_v37 = vmax.f32 %v247_v36, 0.0 }
 0x1af   :  { %v249_v38 = vadd.f32 1e-05, %v248_v37 }
 0x1b1   :  { %1408 = vrsqrt.f32 %v249_v38 }
 0x1bb   :  { %v1409_v39 = vpop.eup %1408 }
 0x1bc   :  { %252 = vrot.lane.b32.xlu1 %v1409_v39, %s1421_s11 }
 0x22e   :  { %v253_v40 = vpop.permute.xlu1 %252 }
 0x22f   :  { %v255_v41 = vmul.f32 %v253_v40, %v1540_v46 }
 0x231   :  { %257 = vrot.lane.b32.xlu0 %v255_v41, %s1422_s17  ;;  %v270_v42 = vrot.slane %v255_v41, %v1542_v48 }
 0x235   :  { %272 = vrot.lane.b32.xlu0 %v270_v42, %s1422_s17 }
 0x2a3   :  { %v258_v43 = vpop.permute.xlu0 %257 }
 0x2a4   :  { %v260_v44 = vmul.f32 %v258_v43, %v244_v33 }
 0x2a6   :  { %v262_v45 = vrot.slane %v260_v44, 7 }
 0x2a7   :  { %v273_v56 = vpop.permute.xlu0 %272 }
 0x2a8   :  { %263 = vrot.lane.b32.xlu1 %v262_v45, %s1421_s11  ;;  %v275_v57 = vmul.f32 %v273_v56, %v1571_v1  ;;  %v276_v58 = vmul.f32 %v273_v56, %v1575_v5  ;;  %v277_v59 = vmul.f32 %v273_v56, %v214_v14  ;;  %v467_v45 = vld [vmem:[%s1790_s4] sm:$0xff] }
 0x2a9   :  { %v1360_v50 = vpack.c.bf16 %v468_v47, %v467_v45 }
 0x2ab   :  { %1361 = vmatpush3.bf16.msra.mxu0 %v1360_v50 }
 0x2ac   :  { %1362 = vmatprep.subr.bf16.mxu0 %v1423_v52 }
 0x31a   :  { %v264_v53 = vpop.permute.xlu1 %263 }
 0x31b   :  { %v266_v54 = vsub.f32 %v1540_v46, %v264_v53  ;;  %v470_v53 = vld [vmem:[%s1790_s4 + $0x18] sm:$0xff] }
 0x31d   :  { %v281_v55 = vrot.slane %v266_v54, %v1545_v51 }
 0x31f   :  { %283 = vrot.lane.b32.xlu1 %v281_v55, %s1422_s17  ;;  %v1363_v55 = vpack.c.bf16 %v470_v53, %v469_v49 }
 0x321   :  { %1364 = vmatpush3.bf16.msra.mxu0 %v1363_v55 }
 0x322   :  { %1365 = vmatprep.subr.bf16.mxu0 %v1423_v52 }
 0x391   :  { %v284_v60 = vpop.permute.xlu1 %283 }
 0x392   :  { %v286_v61 = vadd.f32 %v284_v60, %v275_v57  ;;  %v287_v62 = vadd.f32 %v284_v60, %v276_v58  ;;  %v288_v63 = vadd.f32 %v284_v60, %v277_v59 }
 0x394   :  { %v289_v0 = vmax.f32 %v286_v61, 0.0  ;;  %v290_v2 = vmax.f32 %v287_v62, 0.0  ;;  %v291_v3 = vmax.f32 %v288_v63, 0.0  ;;  %v711_v61 = vld [vmem:[%s1791_s5] sm:$0xf] }
 0x396   :  { %460 = vst.msk [vmem:[%s1789_s12] sm:$0xff] %vm218_vm2, %v289_v0  ;;  %461 = vst.msk [vmem:[%s1789_s12 + $0x8] sm:$0xff] %vm218_vm2, %v290_v2  ;;  %1287 = vmatmul.mubr.msk.f32.vlgmr.msra.gmra.mrb[0].mxu1 %vm218_vm2, %v289_v0 }
 0x397   :  { %462 = vst.msk [vmem:[%s1789_s12 + $0x10] sm:$0xff] %vm218_vm2, %v291_v3  ;;  %1289 = vmatprep.mubr.msk.f32.mxu1 %vm1420_vm0, %v1419_v4  ;;  %s1424_s12 = smov 24   ;;  %1329 = vmatpush3.msk.msra.mxu1 %vm715_vm4, %v711_v61 }
 0x398   :  { %1377 = vmatprep.subr.bf16.mxu1 %v1423_v52 }
 0x39a   :  { %1290 = vmatmul.mubr.msk.f32.gmra.mrb[2].mxu1 %vm218_vm2, %v290_v2 }
 0x39b   :  { %1292 = vmatprep.mubr.msk.f32.mxu1 %vm1420_vm0, %v1419_v4 }
 0x39e   :  { %1293 = vmatmul.mubr.msk.f32.gmra.mrb[4].mxu1 %vm218_vm2, %v291_v3  ;;  %v1220_v3 = vld [vmem:[%s1790_s4 + $0x20] sm:$0xff] }
 0x39f   :  { %1330 = vmatprep.mubr.msk.f32.mxu1 %vm1420_vm0, %v1419_v4 }
 0x469   :  { %v1623_v1 = vpop.f32.mrb[0].mxu1 }
 0x46a   :  { %v1288_v5 = vpop.f32.mrb[1].mxu1  ;;  %v395_v6 = vmul.f32 %v1623_v1, %v1623_v1  ;;  %v384_v8 = vsel %vm383_vm3, %v1623_v1, 0.0 }
 0x46b   :  { %v1221_v5 = vld [vmem:[%s1790_s4 + $0x28] sm:$0xff] }
 0x46c   :  { %v398_v13 = vsel %vm383_vm3, %v395_v6, 0.0 }
 0x46d   :  { %v1627_v7 = vpop.f32.mrb[2].mxu1 }
 0x46e   :  { %v385_v9 = vsel %vm383_vm3, %v1627_v7, 0.0  ;;  %v396_v10 = vmul.f32 %v1627_v7, %v1627_v7  ;;  %v1291_v11 = vpop.f32.mrb[3].mxu1 }
 0x46f   :  { %v386_v12 = vadd.f32 %v385_v9, %v384_v8  ;;  %v1366_v11 = vpack.c.bf16 %v1221_v5, %v1220_v3 }
 0x470   :  { %v399_v14 = vsel %vm383_vm3, %v396_v10, 0.0 }
 0x471   :  { %v400_v15 = vadd.f32 %v399_v14, %v398_v13  ;;  %v379_v16 = vpop.f32.mrb[4].mxu1 }
 0x472   :  { %v387_v17 = vsel %vm383_vm3, %v379_v16, 0.0  ;;  %v397_v18 = vmul.f32 %v379_v16, %v379_v16  ;;  %v1294_v19 = vpop.f32.mrb[5].mxu1 }
 0x473   :  { %v388_v20 = vadd.f32 %v387_v17, %v386_v12  ;;  %v1226_v17 = vld [vmem:[%s1790_s4 + $0x48] sm:$0xff]  ;;  %v1227_v19 = vld [vmem:[%s1790_s4 + $0x50] sm:$0xff] }
 0x474   :  { %v401_v21 = vsel %vm383_vm3, %v397_v18, 0.0 }
 0x475   :  { %v389_v22 = vrot.slane %v388_v20, 4  ;;  %v402_v23 = vadd.f32 %v401_v21, %v400_v15 }
 0x477   :  { %v390_v24 = vadd.f32 %v389_v22, %v388_v20  ;;  %v403_v25 = vrot.slane %v402_v23, 4  ;;  %v1228_v20 = vld [vmem:[%s1790_s4 + $0x58] sm:$0xff]  ;;  %v1717_v22 = vld [vmem:[%s1793_s10] ss:$0 sm:$0xff]  ;;  %s1426_s10 = smov 56  }
 0x478   :  { %v1375_v21 = vpack.c.bf16 %v1228_v20, %v1227_v19 }
 0x479   :  { %v391_v26 = vrot.slane %v390_v24, 2  ;;  %v404_v27 = vadd.f32 %v403_v25, %v402_v23 }
 0x47b   :  { %v392_v28 = vadd.f32 %v391_v26, %v390_v24  ;;  %v405_v29 = vrot.slane %v404_v27, 2 }
 0x47d   :  { %v393_v30 = vrot.slane %v392_v28, 1  ;;  %v406_v31 = vadd.f32 %v405_v29, %v404_v27 }
 0x47f   :  { %v394_v32 = vadd.f32 %v393_v30, %v392_v28  ;;  %v407_v33 = vrot.slane %v406_v31, 1 }
 0x481   :  { %v408_v34 = vadd.f32 %v407_v33, %v406_v31  ;;  %v409_v35 = vmul.f32 0.041666668, %v394_v32 }
 0x483   :  { %v410_v36 = vmul.f32 0.041666668, %v408_v34  ;;  %v411_v37 = vmul.f32 %v409_v35, %v409_v35 }
 0x485   :  { %v412_v38 = vsub.f32 %v410_v36, %v411_v37 }
 0x487   :  { %v413_v39 = vmax.f32 %v412_v38, 0.0 }
 0x489   :  { %v414_v40 = vadd.f32 1e-05, %v413_v39 }
 0x48b   :  { %1410 = vrsqrt.f32 %v414_v40 }
 0x495   :  { %v1411_v41 = vpop.eup %1410 }
 0x496   :  { %417 = vrot.lane.b32.xlu0 %v1411_v41, %s1424_s12 }
 0x508   :  { %v418_v42 = vpop.permute.xlu0 %417 }
 0x509   :  { %v420_v43 = vmul.f32 %v418_v42, %v1540_v46 }
 0x50b   :  { %422 = vrot.lane.b32.xlu1 %v420_v43, %s1425_s27  ;;  %v435_v44 = vrot.slane %v420_v43, %v1542_v48 }
 0x50f   :  { %437 = vrot.lane.b32.xlu1 %v435_v44, %s1425_s27 }
 0x57d   :  { %v423_v54 = vpop.permute.xlu1 %422 }
 0x57e   :  { %v425_v56 = vmul.f32 %v423_v54, %v409_v35 }
 0x580   :  { %v427_v57 = vrot.slane %v425_v56, 7 }
 0x581   :  { %v438_v62 = vpop.permute.xlu1 %437 }
 0x582   :  { %428 = vrot.lane.b32.xlu0 %v427_v57, %s1424_s12  ;;  %v440_v63 = vmul.f32 %v438_v62, %v1623_v1  ;;  %v441_v0 = vmul.f32 %v438_v62, %v1627_v7  ;;  %v442_v2 = vmul.f32 %v438_v62, %v379_v16  ;;  %v1222_v1 = vld [vmem:[%s1790_s4 + $0x30] sm:$0xff]  ;;  %v1223_v7 = vld [vmem:[%s1790_s4 + $0x38] sm:$0xff]  ;;  %v1225_v16 = vld [vmem:[%s1790_s4 + $0x40] sm:$0xff] }
 0x583   :  { %v1369_v15 = vpack.c.bf16 %v1223_v7, %v1222_v1  ;;  %v1372_v18 = vpack.c.bf16 %v1226_v17, %v1225_v16  ;;  %v846_v57 = vld [vmem:[%s1795_s6] sm:$0xff] }
 0x5f4   :  { %v429_v58 = vpop.permute.xlu0 %428 }
 0x5f5   :  { %v431_v59 = vsub.f32 %v1540_v46, %v429_v58  ;;  %v847_v58 = vld [vmem:[%s1795_s6 + $0x8] sm:$0xff] }
 0x5f7   :  { %v446_v60 = vrot.slane %v431_v59, %v1545_v51  ;;  %v1378_v59 = vpack.c.bf16 %v847_v58, %v846_v57 }
 0x5f9   :  { %448 = vrot.lane.b32.xlu0 %v446_v60, %s1425_s27 }
 0x66b   :  { %v449_v6 = vpop.permute.xlu0 %448 }
 0x66c   :  { %v451_v8 = vadd.f32 %v449_v6, %v440_v63  ;;  %v452_v9 = vadd.f32 %v449_v6, %v441_v0  ;;  %v453_v10 = vadd.f32 %v449_v6, %v442_v2  ;;  %v848_v63 = vld [vmem:[%s1795_s6 + $0x10] sm:$0xff]  ;;  %v849_v0 = vld [vmem:[%s1795_s6 + $0x18] sm:$0xff]  ;;  %s1428_s6 = smov 88  }
 0x66d   :  { %v1381_v2 = vpack.c.bf16 %v849_v0, %v848_v63 }
 0x66e   :  { %v454_v12 = vmax.f32 %v451_v8, 0.0  ;;  %v455_v13 = vmax.f32 %v452_v9, 0.0  ;;  %v456_v14 = vmax.f32 %v453_v10, 0.0 }
 0x670   :  { %463 = vst.msk [vmem:[%s1792_s13] sm:$0xff] %vm383_vm3, %v454_v12  ;;  %464 = vst.msk [vmem:[%s1792_s13 + $0x8] sm:$0xff] %vm383_vm3, %v455_v13  ;;  %1304 = vmatmul.mubr.msk.f32.vlgmr.msra.gmra.mrb[6].mxu0 %vm383_vm3, %v454_v12 }
 0x671   :  { %465 = vst.msk [vmem:[%s1792_s13 + $0x10] sm:$0xff] %vm383_vm3, %v456_v14  ;;  %1367 = vmatpush3.bf16.msra.mxu0 %v1366_v11  ;;  %1314 = vmatprep.mubr.msk.f32.mxu0 %vm1420_vm0, %v1419_v4 }
 0x672   :  { %1368 = vmatprep.subr.bf16.mxu0 %v1423_v52 }
 0x675   :  { %1370 = vmatpush3.bf16.msra.mxu0 %v1369_v15 }
 0x676   :  { %1371 = vmatprep.subr.bf16.mxu0 %v1423_v52 }
 0x678   :  { %1315 = vmatmul.mubr.msk.f32.vlgmr.msra.gmra.mrb[6].mxu0 %vm383_vm3, %v455_v13 }
 0x679   :  { %1373 = vmatpush3.bf16.msra.mxu0 %v1372_v18  ;;  %1325 = vmatprep.mubr.msk.f32.mxu0 %vm1420_vm0, %v1419_v4 }
 0x67a   :  { %1374 = vmatprep.subr.bf16.mxu0 %v1423_v52 }
 0x67d   :  { %1376 = vmatpush3.bf16.msra.mxu0 %v1375_v21 }
 0x680   :  { %1326 = vmatmul.mubr.msk.f32.vlgmr.msra.gmra.mrb[6].mxu0 %vm383_vm3, %v456_v14 }
 0x753   :  { %v704_v23 = vpop.f32.mrb[6].mxu0 }
 0x754   :  { %v1386_v24 = vadd.f32 %v1717_v22, %v704_v23  ;;  %v1327_v25 = vpop.f32.mrb[7].mxu0 }
 0x756   :  { %710 = vst.msk [vmem:[%s1794_s14] sm:$0xff] %vm709_vm5, %v1386_v24  ;;  %1331 = vmatmul.mubr.msk.f32.vlgmr.msra.gmra.mrb[6].mxu1 %vm709_vm5, %v1386_v24  ;;  %s1427_s14 = smov 72  }
 0x757   :  { %1341 = vmatprep.mubr.msk.f32.mxu1 %vm1420_vm0, %v1419_v4  ;;  %1379 = vmatpush3.bf16.msra.mxu1 %v1378_v59 }
 0x758   :  { %1380 = vmatprep.subr.bf16.mxu1 %v1423_v52 }
 0x75b   :  { %1382 = vmatpush3.bf16.msra.mxu1 %v1381_v2 }
 0x75c   :  { %1383 = vmatprep.subr.bf16.mxu1 %v1423_v52 }
 0x829   :  { %v785_v26 = vpop.f32.mrb[6].mxu1 }
 0x82a   :  { %v789_v27 = vsel %vm383_vm3, %v785_v26, 0.0  ;;  %v796_v28 = vmul.f32 %v785_v26, %v785_v26  ;;  %v1332_v29 = vpop.f32.mrb[7].mxu1 }
 0x82b   :  { %v790_v30 = vrot.slane %v789_v27, 4 }
 0x82c   :  { %v797_v31 = vsel %vm383_vm3, %v796_v28, 0.0 }
 0x82d   :  { %v791_v32 = vadd.f32 %v790_v30, %v789_v27  ;;  %v798_v33 = vrot.slane %v797_v31, 4 }
 0x82f   :  { %v792_v34 = vrot.slane %v791_v32, 2  ;;  %v799_v35 = vadd.f32 %v798_v33, %v797_v31 }
 0x831   :  { %v793_v36 = vadd.f32 %v792_v34, %v791_v32  ;;  %v800_v37 = vrot.slane %v799_v35, 2 }
 0x833   :  { %v794_v38 = vrot.slane %v793_v36, 1  ;;  %v801_v39 = vadd.f32 %v800_v37, %v799_v35 }
 0x835   :  { %v795_v40 = vadd.f32 %v794_v38, %v793_v36  ;;  %v802_v41 = vrot.slane %v801_v39, 1 }
 0x837   :  { %v803_v42 = vadd.f32 %v802_v41, %v801_v39  ;;  %v804_v43 = vmul.f32 0.125, %v795_v40  ;;  %v980_v41 = vld [vmem:[%s1796_s7] sm:$0xff] }
 0x839   :  { %v805_v44 = vmul.f32 0.125, %v803_v42  ;;  %v806_v45 = vmul.f32 %v804_v43, %v804_v43  ;;  %v981_v42 = vld [vmem:[%s1796_s7 + $0x8] sm:$0xff] }
 0x83b   :  { %v807_v47 = vsub.f32 %v805_v44, %v806_v45 }
 0x83d   :  { %v808_v49 = vmax.f32 %v807_v47, 0.0 }
 0x83f   :  { %v809_v50 = vadd.f32 1e-05, %v808_v49 }
 0x841   :  { %1412 = vrsqrt.f32 %v809_v50 }
 0x84b   :  { %v1413_v53 = vpop.eup %1412 }
 0x84c   :  { %812 = vrot.lane.b32.xlu1 %v1413_v53, %s1426_s10 }
 0x8be   :  { %v813_v54 = vpop.permute.xlu1 %812 }
 0x8bf   :  { %v815_v55 = vmul.f32 %v813_v54, %v1540_v46 }
 0x8c1   :  { %817 = vrot.lane.b32.xlu0 %v815_v55, %s1427_s14  ;;  %v830_v56 = vrot.slane %v815_v55, %v1542_v48 }
 0x8c5   :  { %832 = vrot.lane.b32.xlu0 %v830_v56, %s1427_s14 }
 0x933   :  { %v818_v60 = vpop.permute.xlu0 %817 }
 0x934   :  { %v820_v61 = vmul.f32 %v818_v60, %v804_v43  ;;  %v1384_v43 = vpack.c.bf16 %v981_v42, %v980_v41 }
 0x936   :  { %v822_v62 = vrot.slane %v820_v61, 7 }
 0x937   :  { %v833_v8 = vpop.permute.xlu0 %832 }
 0x938   :  { %823 = vrot.lane.b32.xlu1 %v822_v62, %s1426_s10  ;;  %v835_v9 = vmul.f32 %v833_v8, %v785_v26 }
 0x9aa   :  { %v824_v3 = vpop.permute.xlu1 %823 }
 0x9ab   :  { %v826_v5 = vsub.f32 %v1540_v46, %v824_v3 }
 0x9ad   :  { %v839_v6 = vrot.slane %v826_v5, %v1545_v51 }
 0x9af   :  { %841 = vrot.lane.b32.xlu1 %v839_v6, %s1427_s14 }
 0xa21   :  { %v842_v10 = vpop.permute.xlu1 %841 }
 0xa22   :  { %v844_v11 = vadd.f32 %v842_v10, %v835_v9 }
 0xa24   :  { %v845_v12 = vmax.f32 %v844_v11, 0.0 }
 0xa26   :  { %1342 = vmatmul.mubr.msk.f32.vlgmr.msra.gmra.mrb[8].mxu1 %vm383_vm3, %v845_v12 }
 0xa27   :  { %1348 = vmatprep.mubr.msk.f32.mxu1 %vm1420_vm0, %v1419_v4  ;;  %1385 = vmatpush3.bf16.msra.mxu1 %v1384_v43 }
 0xa28   :  { %1351 = vmatprep.subr.mxu1 %v1419_v4 }
 0xaf9   :  { %v919_v13 = vpop.f32.mrb[8].mxu1 }
 0xafa   :  { %v923_v14 = vsel %vm218_vm2, %v919_v13, 0.0  ;;  %v930_v52 = vmul.f32 %v919_v13, %v919_v13  ;;  %v1343_v1 = vpop.f32.mrb[9].mxu1 }
 0xafb   :  { %v924_v7 = vrot.slane %v923_v14, 4 }
 0xafc   :  { %v931_v15 = vsel %vm218_vm2, %v930_v52, 0.0 }
 0xafd   :  { %v925_v16 = vadd.f32 %v924_v7, %v923_v14  ;;  %v932_v17 = vrot.slane %v931_v15, 4 }
 0xaff   :  { %v926_v18 = vrot.slane %v925_v16, 2  ;;  %v933_v19 = vadd.f32 %v932_v17, %v931_v15 }
 0xb01   :  { %v927_v20 = vadd.f32 %v926_v18, %v925_v16  ;;  %v934_v21 = vrot.slane %v933_v19, 2 }
 0xb03   :  { %v928_v23 = vrot.slane %v927_v20, 1  ;;  %v935_v24 = vadd.f32 %v934_v21, %v933_v19  ;;  %v1112_v21 = vld [vmem:[%s1797_s8] sm:$0xff] }
 0xb05   :  { %v929_v25 = vadd.f32 %v928_v23, %v927_v20  ;;  %v936_v26 = vrot.slane %v935_v24, 1 }
 0xb07   :  { %v937_v27 = vadd.f32 %v936_v26, %v935_v24  ;;  %v938_v28 = vmul.f32 0.125, %v929_v25 }
 0xb09   :  { %v939_v29 = vmul.f32 0.125, %v937_v27  ;;  %v940_v30 = vmul.f32 %v938_v28, %v938_v28 }
 0xb0b   :  { %v941_v31 = vsub.f32 %v939_v29, %v940_v30 }
 0xb0d   :  { %v942_v32 = vmax.f32 %v941_v31, 0.0 }
 0xb0f   :  { %v943_v33 = vadd.f32 1e-05, %v942_v32 }
 0xb11   :  { %1414 = vrsqrt.f32 %v943_v33 }
 0xb1b   :  { %v1415_v34 = vpop.eup %1414 }
 0xb1c   :  { %946 = vrot.lane.b32.xlu0 %v1415_v34, %s1428_s6 }
 0xb8e   :  { %v947_v35 = vpop.permute.xlu0 %946 }
 0xb8f   :  { %v949_v36 = vmul.f32 %v947_v35, %v1540_v46 }
 0xb91   :  { %951 = vrot.lane.b32.xlu1 %v949_v36, %s1429_s0  ;;  %v964_v37 = vrot.slane %v949_v36, %v1542_v48 }
 0xb95   :  { %966 = vrot.lane.b32.xlu1 %v964_v37, %s1429_s0 }
 0xc03   :  { %v952_v38 = vpop.permute.xlu1 %951 }
 0xc04   :  { %v954_v39 = vmul.f32 %v952_v38, %v938_v28 }
 0xc06   :  { %v956_v40 = vrot.slane %v954_v39, 7 }
 0xc07   :  { %v967_v49 = vpop.permute.xlu1 %966 }
 0xc08   :  { %957 = vrot.lane.b32.xlu0 %v956_v40, %s1428_s6  ;;  %v969_v50 = vmul.f32 %v967_v49, %v919_v13 }
 0xc7a   :  { %v958_v44 = vpop.permute.xlu0 %957 }
 0xc7b   :  { %v960_v45 = vsub.f32 %v1540_v46, %v958_v44 }
 0xc7d   :  { %v973_v47 = vrot.slane %v960_v45, %v1545_v51 }
 0xc7f   :  { %975 = vrot.lane.b32.xlu0 %v973_v47, %s1429_s0 }
 0xcf1   :  { %v976_v53 = vpop.permute.xlu0 %975 }
 0xcf2   :  { %v978_v54 = vadd.f32 %v976_v53, %v969_v50 }
 0xcf4   :  { %v979_v55 = vmax.f32 %v978_v54, 0.0 }
 0xcf6   :  { %1349 = vmatmul.mubr.msk.f32.vlgmr.msra.gmra.mrb[10].mxu1 %vm218_vm2, %v979_v55 }
 0xcf7   :  { %1353 = vmatprep.mubr.msk.f32.mxu1 %vm1420_vm0, %v1419_v4  ;;  %1352 = vmatpush3.msra.mxu1 %v1112_v21 }
 0xdc9   :  { %v1051_v56 = vpop.f32.mrb[10].mxu1 }
 0xdca   :  { %v1055_v57 = vsel %vm72_vm1, %v1051_v56, 0.0  ;;  %v1062_v58 = vmul.f32 %v1051_v56, %v1051_v56  ;;  %v1350_v59 = vpop.f32.mrb[11].mxu1 }
 0xdcb   :  { %v1056_v60 = vrot.slane %v1055_v57, 4 }
 0xdcc   :  { %v1063_v61 = vsel %vm72_vm1, %v1062_v58, 0.0 }
 0xdcd   :  { %v1057_v62 = vadd.f32 %v1056_v60, %v1055_v57  ;;  %v1064_v63 = vrot.slane %v1063_v61, 4 }
 0xdcf   :  { %v1058_v0 = vrot.slane %v1057_v62, 2  ;;  %v1065_v2 = vadd.f32 %v1064_v63, %v1063_v61 }
 0xdd1   :  { %v1059_v3 = vadd.f32 %v1058_v0, %v1057_v62  ;;  %v1066_v5 = vrot.slane %v1065_v2, 2 }
 0xdd3   :  { %v1060_v6 = vrot.slane %v1059_v3, 1  ;;  %v1067_v8 = vadd.f32 %v1066_v5, %v1065_v2 }
 0xdd5   :  { %v1061_v9 = vadd.f32 %v1060_v6, %v1059_v3  ;;  %v1068_v10 = vrot.slane %v1067_v8, 1 }
 0xdd7   :  { %v1069_v11 = vadd.f32 %v1068_v10, %v1067_v8  ;;  %v1070_v4 = vmul.f32 0.125, %v1061_v9 }
 0xdd9   :  { %v1071_v12 = vmul.f32 0.125, %v1069_v11  ;;  %v1072_v13 = vmul.f32 %v1070_v4, %v1070_v4 }
 0xddb   :  { %v1073_v14 = vsub.f32 %v1071_v12, %v1072_v13 }
 0xddd   :  { %v1074_v52 = vmax.f32 %v1073_v14, 0.0 }
 0xddf   :  { %v1075_v1 = vadd.f32 1e-05, %v1074_v52 }
 0xde1   :  { %1416 = vrsqrt.f32 %v1075_v1 }
 0xdeb   :  { %v1417_v7 = vpop.eup %1416 }
 0xdec   :  { %1078 = vrot.lane.b32.xlu1 %v1417_v7, %s1425_s27 }
 0xe5e   :  { %v1079_v15 = vpop.permute.xlu1 %1078 }
 0xe5f   :  { %v1081_v16 = vmul.f32 %v1079_v15, %v1540_v46 }
 0xe61   :  { %1083 = vrot.lane.b32.xlu0 %v1081_v16, %s1424_s12  ;;  %v1096_v17 = vrot.slane %v1081_v16, %v1542_v48 }
 0xe65   :  { %1098 = vrot.lane.b32.xlu0 %v1096_v17, %s1424_s12 }
 0xe69   :  { %1113 = vrot.lane.b32.xlu0 %v1717_v22, %s1430_s30 }
 0xed3   :  { %v1084_v18 = vpop.permute.xlu0 %1083 }
 0xed4   :  { %v1086_v19 = vmul.f32 %v1084_v18, %v1070_v4 }
 0xed6   :  { %v1088_v20 = vrot.slane %v1086_v19, 7 }
 0xed7   :  { %v1099_v25 = vpop.permute.xlu0 %1098 }
 0xed8   :  { %1089 = vrot.lane.b32.xlu1 %v1088_v20, %s1425_s27  ;;  %v1101_v26 = vmul.f32 %v1099_v25, %v1051_v56 }
 0xedb   :  { %v1114_v30 = vpop.permute.xlu0 %1113 }
 0xf4a   :  { %v1090_v23 = vpop.permute.xlu1 %1089 }
 0xf4b   :  { %v1092_v24 = vsub.f32 %v1540_v46, %v1090_v23 }
 0xf4d   :  { %v1105_v48 = vrot.slane %v1092_v24, %v1545_v51 }
 0xf4f   :  { %1107 = vrot.lane.b32.xlu1 %v1105_v48, %s1424_s12 }
 0xfc1   :  { %v1108_v27 = vpop.permute.xlu1 %1107 }
 0xfc2   :  { %v1110_v28 = vadd.f32 %v1108_v27, %v1101_v26 }
 0xfc4   :  { %v1111_v29 = vmax.f32 %v1110_v28, 0.0 }
 0xfc6   :  { %1354 = vmatmul.mubr.msk.f32.vlgmr.msra.gmra.mrb[12].mxu1 %vm72_vm1, %v1111_v29 }
0x1099   :  { %v1185_v31 = vpop.f32.mrb[12].mxu1 }
0x109a   :  { %v1186_v32 = vadd.f32 %v1185_v31, %v1114_v30  ;;  %v1355_v33 = vpop.f32.mrb[13].mxu1 }
0x109c   :  { %1190 = vst.msk [vmem:[%s1798_s15] sm:$0xff] %vm1189_vm6, %v1186_v32 }

</bundles_post_ra>
